<compile_context>
chip_gen: v5e
topology: v5e:2x2
jax: 0.10.0
libtpu: 0.0.40
codegen_flags: <defaults>
</compile_context>

<pallas_src>
import math

import jax
import jax.numpy as jnp
import numpy as np
from jax.experimental import pallas as pl
from jax.experimental.pallas import tpu as pltpu


def decoder_kernel(emb_ref, enc_ref, h0_ref,
                   wa_h_ref, wa_e_ref, ba_ref, va_ref,
                   wih_e_ref, wih_c_ref, whh_ref, bih_ref, bhh_ref,
                   wfc_o_ref, wfc_c_ref, wfc_e_ref, bfc_ref,
                   pred_ref, hN_ref):
    """One decoding step: attention -> context -> GRU cell -> output projection."""
    emb = emb_ref[...]                      # (Bp, E)
    enc = enc_ref[...]                      # (Bp, S, Eh)  batch-first encoder outputs
    h0 = h0_ref[...]                        # (Bp, Dh)     last-layer decoder hidden
    Bp, S, Eh = enc.shape
    Da = wa_h_ref.shape[-1]

    # ---- additive (Bahdanau) attention; concat replaced by split matmuls ----
    h_part = jnp.dot(h0, wa_h_ref[...], preferred_element_type=jnp.float32)            # (Bp, Da)
    e_part = jnp.dot(enc.reshape(Bp * S, Eh), wa_e_ref[...],
                     preferred_element_type=jnp.float32).reshape(Bp, S, Da)             # (Bp, S, Da)
    energy = jnp.tanh(e_part + h_part[:, None, :] + ba_ref[...][None, :, :])            # (Bp, S, Da)
    scores = jnp.sum(energy * va_ref[...][None, :, :], axis=-1)                         # (Bp, S)

    # softmax over the source-length (lane) axis
    scores = scores - jnp.max(scores, axis=-1, keepdims=True)
    expw = jnp.exp(scores)
    attn = expw / jnp.sum(expw, axis=-1, keepdims=True)                                 # (Bp, S)

    # context[b, :] = sum_s attn[b, s] * enc[b, s, :]   (batched 1xS @ SxEh matmul)
    context = jnp.einsum('bqs,bse->bqe', attn[:, None, :], enc,
                         preferred_element_type=jnp.float32).reshape(Bp, Eh)            # (Bp, Eh)

    # ---- single GRU step, PyTorch gate order (r, z, n); per-gate lane-aligned weights ----
    gr = (jnp.dot(emb, wih_e_ref[0], preferred_element_type=jnp.float32)
          + jnp.dot(context, wih_c_ref[0], preferred_element_type=jnp.float32) + bih_ref[0])
    gz = (jnp.dot(emb, wih_e_ref[1], preferred_element_type=jnp.float32)
          + jnp.dot(context, wih_c_ref[1], preferred_element_type=jnp.float32) + bih_ref[1])
    gn = (jnp.dot(emb, wih_e_ref[2], preferred_element_type=jnp.float32)
          + jnp.dot(context, wih_c_ref[2], preferred_element_type=jnp.float32) + bih_ref[2])
    hr = jnp.dot(h0, whh_ref[0], preferred_element_type=jnp.float32) + bhh_ref[0]
    hz = jnp.dot(h0, whh_ref[1], preferred_element_type=jnp.float32) + bhh_ref[1]
    hn = jnp.dot(h0, whh_ref[2], preferred_element_type=jnp.float32) + bhh_ref[2]

    r = jax.nn.sigmoid(gr + hr)
    z = jax.nn.sigmoid(gz + hz)
    n = jnp.tanh(gn + r * hn)
    h_new = (1.0 - z) * n + z * h0                                                      # (Bp, Dh)

    # ---- fc over concat(output, context, embedded) as 3 split matmuls.
    #      Vocab dim pre-padded to a 128-lane multiple -> unmasked lane-dense store. ----
    logits = (jnp.dot(h_new, wfc_o_ref[...], preferred_element_type=jnp.float32)
              + jnp.dot(context, wfc_c_ref[...], preferred_element_type=jnp.float32)
              + jnp.dot(emb, wfc_e_ref[...], preferred_element_type=jnp.float32)
              + bfc_ref[...])                                                            # (Bp, Vp)

    pred_ref[...] = logits
    hN_ref[...] = h_new


def decoder_forward(dec_input, decoder_hidden, encoder_outputs, params, out_dim):
    """Mirrors Decoder.forward. dec_input (B,) int32, decoder_hidden (L,B,Dh),
    encoder_outputs (S,B,Eh). Returns (prediction (B,V), hidden (1,B,Dh))."""
    (emb_table, wa_h, wa_e, ba, va,
     wih_e, wih_c, whh, bih, bhh,
     wfc_o, wfc_c, wfc_e, bfc) = params

    B = dec_input.shape[0]
    S, _, Eh = encoder_outputs.shape
    Dh = decoder_hidden.shape[-1]
    E = emb_table.shape[1]
    Da = wa_h.shape[1]
    Vp = bfc.shape[1]

    # --- XLA glue: embedding gather (dropout = identity at inference), batch padding ---
    emb = jnp.take(emb_table, dec_input, axis=0)                 # (B, E)
    enc_b = jnp.transpose(encoder_outputs, (1, 0, 2))            # (B, S, Eh)
    h0 = decoder_hidden[-1]                                      # (B, Dh)

    Bp = ((B + 7) // 8) * 8                                      # pad batch to 8 sublanes
    pad_b = Bp - B
    emb_p = jnp.pad(emb, ((0, pad_b), (0, 0)))
    enc_p = jnp.pad(enc_b, ((0, pad_b), (0, 0), (0, 0)))
    h0_p = jnp.pad(h0, ((0, pad_b), (0, 0)))

    flops = 2 * Bp * (Dh * Da + S * Eh * Da + S * Da + S * Eh
                      + (E + Eh + Dh) * 3 * Dh + (Dh + Eh + E) * Vp)
    transcendentals = Bp * (S * Da + S + 3 * Dh)
    bytes_in = 4 * (emb_p.size + enc_p.size + h0_p.size + wa_h.size + wa_e.size + ba.size
                    + va.size + wih_e.size + wih_c.size + whh.size + bih.size + bhh.size
                    + wfc_o.size + wfc_c.size + wfc_e.size + bfc.size)
    bytes_out = 4 * (Bp * Vp + Bp * Dh)

    pred_pad, h_new_pad = pl.pallas_call(
        decoder_kernel,
        out_shape=(jax.ShapeDtypeStruct((Bp, Vp), jnp.float32),
                   jax.ShapeDtypeStruct((Bp, Dh), jnp.float32)),
        in_specs=[pl.BlockSpec(memory_space=pltpu.MemorySpace.VMEM)] * 16,
        out_specs=(pl.BlockSpec(memory_space=pltpu.MemorySpace.VMEM),
                   pl.BlockSpec(memory_space=pltpu.MemorySpace.VMEM)),
        cost_estimate=pl.CostEstimate(flops=int(flops),
                                      transcendentals=int(transcendentals),
                                      bytes_accessed=int(bytes_in + bytes_out)),
    )(emb_p, enc_p, h0_p, wa_h, wa_e, ba, va,
      wih_e, wih_c, whh, bih, bhh, wfc_o, wfc_c, wfc_e, bfc)

    prediction = pred_pad[:B, :out_dim]                          # un-pad batch & vocab
    hidden = h_new_pad[:B][None]                                 # (1, B, Dh)
    return prediction, hidden


def reference_forward(dec_input, decoder_hidden, encoder_outputs, raw):
    """Pure-JAX reference replicating the PyTorch Decoder.forward math."""
    (emb_table, W_attn, b_attn, v_attn, W_ih, W_hh, b_ih, b_hh, W_fc, b_fc) = raw
    Dh = W_hh.shape[1]
    B = dec_input.shape[0]
    S = encoder_outputs.shape[0]

    embedded = jnp.take(emb_table, dec_input, axis=0)            # (B, E)
    h = decoder_hidden[-1]                                       # (B, Dh)
    enc_b = jnp.transpose(encoder_outputs, (1, 0, 2))            # (B, S, Eh)

    h_rep = jnp.broadcast_to(h[:, None, :], (B, S, Dh))
    energy = jnp.tanh(jnp.concatenate([h_rep, enc_b], axis=-1) @ W_attn.T + b_attn)
    scores = energy @ v_attn                                     # (B, S)
    attn = jax.nn.softmax(scores, axis=1)
    context = jnp.einsum('bs,bse->be', attn, enc_b)              # (B, Eh)

    x = jnp.concatenate([embedded, context], axis=-1)            # (B, E+Eh)
    gi = x @ W_ih.T + b_ih
    gh = h @ W_hh.T + b_hh
    r = jax.nn.sigmoid(gi[:, :Dh] + gh[:, :Dh])
    z = jax.nn.sigmoid(gi[:, Dh:2 * Dh] + gh[:, Dh:2 * Dh])
    n = jnp.tanh(gi[:, 2 * Dh:] + r * gh[:, 2 * Dh:])
    h_new = (1.0 - z) * n + z * h

    pred = jnp.concatenate([h_new, context, embedded], axis=-1) @ W_fc.T + b_fc
    return pred, h_new[None]


if __name__ == "__main__":
    # Small, module-consistent shapes.
    output_dim, emb_dim = 50, 16
    enc_hid_dim, dec_hid_dim = 32, 32
    attn_dim = dec_hid_dim
    src_len, batch, num_layers = 8, 4, 1

    key = jax.random.PRNGKey(0)
    ks = jax.random.split(key, 13)

    stdv_rnn = 1.0 / math.sqrt(dec_hid_dim)
    emb_table = jax.random.normal(ks[0], (output_dim, emb_dim), jnp.float32)
    W_attn = jax.random.uniform(ks[1], (attn_dim, dec_hid_dim + enc_hid_dim), jnp.float32, -0.1, 0.1)
    b_attn = jax.random.uniform(ks[2], (attn_dim,), jnp.float32, -0.1, 0.1)
    v_attn = jax.random.uniform(ks[3], (attn_dim,), jnp.float32, -0.1, 0.1)
    W_ih = jax.random.uniform(ks[4], (3 * dec_hid_dim, emb_dim + enc_hid_dim), jnp.float32, -stdv_rnn, stdv_rnn)
    W_hh = jax.random.uniform(ks[5], (3 * dec_hid_dim, dec_hid_dim), jnp.float32, -stdv_rnn, stdv_rnn)
    b_ih = jax.random.uniform(ks[6], (3 * dec_hid_dim,), jnp.float32, -stdv_rnn, stdv_rnn)
    b_hh = jax.random.uniform(ks[7], (3 * dec_hid_dim,), jnp.float32, -stdv_rnn, stdv_rnn)
    W_fc = jax.random.uniform(ks[8], (output_dim, dec_hid_dim + enc_hid_dim + emb_dim), jnp.float32, -0.1, 0.1)
    b_fc = jax.random.uniform(ks[9], (output_dim,), jnp.float32, -0.1, 0.1)

    raw = (emb_table, W_attn, b_attn, v_attn, W_ih, W_hh, b_ih, b_hh, W_fc, b_fc)

    # --- convert to kernel layout (split / per-gate / lane-padded weights) ---
    Dh, Eh, E, V = dec_hid_dim, enc_hid_dim, emb_dim, output_dim
    wa_h = jnp.asarray(W_attn[:, :Dh].T)                         # (Dh, Da)
    wa_e = jnp.asarray(W_attn[:, Dh:].T)                         # (Eh, Da)
    ba = b_attn.reshape(1, attn_dim)
    va = v_attn.reshape(1, attn_dim)

    W_ih_T = W_ih.T                                              # (E+Eh, 3Dh)
    wih_e = jnp.stack([W_ih_T[:E, g * Dh:(g + 1) * Dh] for g in range(3)])   # (3, E, Dh)
    wih_c = jnp.stack([W_ih_T[E:, g * Dh:(g + 1) * Dh] for g in range(3)])   # (3, Eh, Dh)
    whh = jnp.stack([W_hh.T[:, g * Dh:(g + 1) * Dh] for g in range(3)])      # (3, Dh, Dh)
    bih = b_ih.reshape(3, 1, Dh)
    bhh = b_hh.reshape(3, 1, Dh)

    Vp = ((V + 127) // 128) * 128                                # pad vocab to 128 lanes
    W_fc_T = jnp.pad(W_fc.T, ((0, 0), (0, Vp - V)))              # (Dh+Eh+E, Vp)
    wfc_o = W_fc_T[:Dh]
    wfc_c = W_fc_T[Dh:Dh + Eh]
    wfc_e = W_fc_T[Dh + Eh:]
    bfc = jnp.pad(b_fc, (0, Vp - V)).reshape(1, Vp)

    params = (emb_table, wa_h, wa_e, ba, va,
              wih_e, wih_c, whh, bih, bhh,
              wfc_o, wfc_c, wfc_e, bfc)

    # --- example inputs ---
    dec_input = jax.random.randint(ks[10], (batch,), 0, output_dim, jnp.int32)
    decoder_hidden = jax.random.normal(ks[11], (num_layers, batch, dec_hid_dim), jnp.float32)
    encoder_outputs = jax.random.normal(ks[12], (src_len, batch, enc_hid_dim), jnp.float32)

    fwd = jax.jit(decoder_forward, static_argnums=(4,))
    prediction, hidden = fwd(dec_input, decoder_hidden, encoder_outputs, params, output_dim)
    jax.block_until_ready((prediction, hidden))

    ref_pred, ref_hid = reference_forward(dec_input, decoder_hidden, encoder_outputs, raw)
    assert prediction.shape == (batch, output_dim)
    assert hidden.shape == (num_layers, batch, dec_hid_dim)
    np.testing.assert_allclose(np.asarray(prediction), np.asarray(ref_pred), rtol=1e-5, atol=1e-5)
    np.testing.assert_allclose(np.asarray(hidden), np.asarray(ref_hid), rtol=1e-5, atol=1e-5)

    print("KERNEL_OK")
</pallas_src>

<mosaic_0001>
module attributes {stable_mosaic.version = 11 : i64} {
  func.func @decoder_kernel(%arg0: memref<8x16xf32, #tpu.memory_space<vmem>>, %arg1: memref<8x8x32xf32, #tpu.memory_space<vmem>>, %arg2: memref<8x32xf32, #tpu.memory_space<vmem>>, %arg3: memref<32x32xf32, #tpu.memory_space<vmem>>, %arg4: memref<32x32xf32, #tpu.memory_space<vmem>>, %arg5: memref<1x32xf32, #tpu.memory_space<vmem>>, %arg6: memref<1x32xf32, #tpu.memory_space<vmem>>, %arg7: memref<3x16x32xf32, #tpu.memory_space<vmem>>, %arg8: memref<3x32x32xf32, #tpu.memory_space<vmem>>, %arg9: memref<3x32x32xf32, #tpu.memory_space<vmem>>, %arg10: memref<3x1x32xf32, #tpu.memory_space<vmem>>, %arg11: memref<3x1x32xf32, #tpu.memory_space<vmem>>, %arg12: memref<32x128xf32, #tpu.memory_space<vmem>>, %arg13: memref<32x128xf32, #tpu.memory_space<vmem>>, %arg14: memref<16x128xf32, #tpu.memory_space<vmem>>, %arg15: memref<1x128xf32, #tpu.memory_space<vmem>>, %arg16: memref<8x128xf32, #tpu.memory_space<vmem>>, %arg17: memref<8x32xf32, #tpu.memory_space<vmem>>) attributes {dimension_semantics = [], scalar_prefetch = 0 : i64, scratch_operands = 0 : i64, tpu.core_type = #tpu.core_type<tc>} {
    %c0 = arith.constant 0 : index
    %c0_0 = arith.constant 0 : index
    %0 = vector.load %arg0[%c0, %c0_0] : memref<8x16xf32, #tpu.memory_space<vmem>>, vector<8x16xf32>
    %c0_1 = arith.constant 0 : index
    %c0_2 = arith.constant 0 : index
    %c0_3 = arith.constant 0 : index
    %1 = vector.load %arg1[%c0_1, %c0_2, %c0_3] : memref<8x8x32xf32, #tpu.memory_space<vmem>>, vector<8x8x32xf32>
    %c0_4 = arith.constant 0 : index
    %c0_5 = arith.constant 0 : index
    %2 = vector.load %arg2[%c0_4, %c0_5] : memref<8x32xf32, #tpu.memory_space<vmem>>, vector<8x32xf32>
    %c0_6 = arith.constant 0 : index
    %c0_7 = arith.constant 0 : index
    %3 = vector.load %arg3[%c0_6, %c0_7] : memref<32x32xf32, #tpu.memory_space<vmem>>, vector<32x32xf32>
    %cst = arith.constant dense<0.000000e+00> : vector<8x32xf32>
    %4 = tpu.matmul %2, %3, %cst {dimension_numbers = #tpu.dot_dimension_numbers<[1], [0], [0], [1], [0, 0, 1, 1], [], []>} : vector<8x32xf32>, vector<32x32xf32>, vector<8x32xf32> -> vector<8x32xf32>
    %5 = vector.shape_cast %1 : vector<8x8x32xf32> to vector<64x32xf32>
    %c0_8 = arith.constant 0 : index
    %c0_9 = arith.constant 0 : index
    %6 = vector.load %arg4[%c0_8, %c0_9] : memref<32x32xf32, #tpu.memory_space<vmem>>, vector<32x32xf32>
    %cst_10 = arith.constant dense<0.000000e+00> : vector<64x32xf32>
    %7 = tpu.matmul %5, %6, %cst_10 {dimension_numbers = #tpu.dot_dimension_numbers<[1], [0], [0], [1], [0, 0, 1, 1], [], []>} : vector<64x32xf32>, vector<32x32xf32>, vector<64x32xf32> -> vector<64x32xf32>
    %8 = vector.shape_cast %7 : vector<64x32xf32> to vector<8x8x32xf32>
    %9 = vector.shape_cast %4 : vector<8x32xf32> to vector<8x1x32xf32>
    %10 = vector.broadcast %9 : vector<8x1x32xf32> to vector<8x8x32xf32>
    %11 = arith.addf %8, %10 : vector<8x8x32xf32>
    %c0_11 = arith.constant 0 : index
    %c0_12 = arith.constant 0 : index
    %12 = vector.load %arg5[%c0_11, %c0_12] : memref<1x32xf32, #tpu.memory_space<vmem>>, vector<1x32xf32>
    %13 = vector.shape_cast %12 : vector<1x32xf32> to vector<1x1x32xf32>
    %14 = vector.broadcast %13 : vector<1x1x32xf32> to vector<8x8x32xf32>
    %15 = arith.addf %11, %14 : vector<8x8x32xf32>
    %16 = math.tanh %15 : vector<8x8x32xf32>
    %c0_13 = arith.constant 0 : index
    %c0_14 = arith.constant 0 : index
    %17 = vector.load %arg6[%c0_13, %c0_14] : memref<1x32xf32, #tpu.memory_space<vmem>>, vector<1x32xf32>
    %18 = vector.shape_cast %17 : vector<1x32xf32> to vector<1x1x32xf32>
    %19 = vector.broadcast %18 : vector<1x1x32xf32> to vector<8x8x32xf32>
    %20 = arith.mulf %16, %19 : vector<8x8x32xf32>
    %cst_15 = arith.constant dense<0.000000e+00> : vector<8x8xf32>
    %21 = vector.multi_reduction <add>, %20, %cst_15 [2] : vector<8x8x32xf32> to vector<8x8xf32>
    %cst_16 = arith.constant dense<0xFF800000> : vector<8xf32>
    %22 = vector.multi_reduction <maximumf>, %21, %cst_16 [1] : vector<8x8xf32> to vector<8xf32>
    %23 = vector.shape_cast %22 : vector<8xf32> to vector<8x1xf32>
    %24 = vector.broadcast %23 : vector<8x1xf32> to vector<8x8xf32>
    %25 = arith.subf %21, %24 : vector<8x8xf32>
    %26 = math.exp %25 : vector<8x8xf32>
    %cst_17 = arith.constant dense<0.000000e+00> : vector<8xf32>
    %27 = vector.multi_reduction <add>, %26, %cst_17 [1] : vector<8x8xf32> to vector<8xf32>
    %28 = vector.shape_cast %27 : vector<8xf32> to vector<8x1xf32>
    %29 = vector.broadcast %28 : vector<8x1xf32> to vector<8x8xf32>
    %30 = arith.divf %26, %29 : vector<8x8xf32>
    %31 = vector.shape_cast %30 : vector<8x8xf32> to vector<8x1x8xf32>
    "tpu.trace_start"() <{level = 10 : i32, message = "bqs,bse->bqe"}> : () -> ()
    %cst_18 = arith.constant dense<0.000000e+00> : vector<8x1x32xf32>
    %32 = tpu.matmul %31, %1, %cst_18 {dimension_numbers = #tpu.dot_dimension_numbers<[2], [1], [1], [2], [0, 0, 0, 1, 1, 2], [0], [0]>} : vector<8x1x8xf32>, vector<8x8x32xf32>, vector<8x1x32xf32> -> vector<8x1x32xf32>
    "tpu.trace_stop"() : () -> ()
    %33 = vector.shape_cast %32 : vector<8x1x32xf32> to vector<8x32xf32>
    %c0_19 = arith.constant 0 : index
    %c0_20 = arith.constant 0 : index
    %c0_21 = arith.constant 0 : index
    %34 = vector.load %arg7[%c0_19, %c0_20, %c0_21] : memref<3x16x32xf32, #tpu.memory_space<vmem>>, vector<1x16x32xf32>
    %35 = vector.shape_cast %34 : vector<1x16x32xf32> to vector<16x32xf32>
    %cst_22 = arith.constant dense<0.000000e+00> : vector<8x32xf32>
    %36 = tpu.matmul %0, %35, %cst_22 {dimension_numbers = #tpu.dot_dimension_numbers<[1], [0], [0], [1], [0, 0, 1, 1], [], []>} : vector<8x16xf32>, vector<16x32xf32>, vector<8x32xf32> -> vector<8x32xf32>
    %c0_23 = arith.constant 0 : index
    %c0_24 = arith.constant 0 : index
    %c0_25 = arith.constant 0 : index
    %37 = vector.load %arg8[%c0_23, %c0_24, %c0_25] : memref<3x32x32xf32, #tpu.memory_space<vmem>>, vector<1x32x32xf32>
    %38 = vector.shape_cast %37 : vector<1x32x32xf32> to vector<32x32xf32>
    %cst_26 = arith.constant dense<0.000000e+00> : vector<8x32xf32>
    %39 = tpu.matmul %33, %38, %cst_26 {dimension_numbers = #tpu.dot_dimension_numbers<[1], [0], [0], [1], [0, 0, 1, 1], [], []>} : vector<8x32xf32>, vector<32x32xf32>, vector<8x32xf32> -> vector<8x32xf32>
    %40 = arith.addf %36, %39 : vector<8x32xf32>
    %c0_27 = arith.constant 0 : index
    %c0_28 = arith.constant 0 : index
    %c0_29 = arith.constant 0 : index
    %41 = vector.load %arg10[%c0_27, %c0_28, %c0_29] : memref<3x1x32xf32, #tpu.memory_space<vmem>>, vector<1x1x32xf32>
    %42 = vector.shape_cast %41 : vector<1x1x32xf32> to vector<1x32xf32>
    %43 = vector.broadcast %42 : vector<1x32xf32> to vector<8x32xf32>
    %44 = arith.addf %40, %43 : vector<8x32xf32>
    %c1 = arith.constant 1 : index
    %c0_30 = arith.constant 0 : index
    %c0_31 = arith.constant 0 : index
    %45 = vector.load %arg7[%c1, %c0_30, %c0_31] : memref<3x16x32xf32, #tpu.memory_space<vmem>>, vector<1x16x32xf32>
    %46 = vector.shape_cast %45 : vector<1x16x32xf32> to vector<16x32xf32>
    %cst_32 = arith.constant dense<0.000000e+00> : vector<8x32xf32>
    %47 = tpu.matmul %0, %46, %cst_32 {dimension_numbers = #tpu.dot_dimension_numbers<[1], [0], [0], [1], [0, 0, 1, 1], [], []>} : vector<8x16xf32>, vector<16x32xf32>, vector<8x32xf32> -> vector<8x32xf32>
    %c1_33 = arith.constant 1 : index
    %c0_34 = arith.constant 0 : index
    %c0_35 = arith.constant 0 : index
    %48 = vector.load %arg8[%c1_33, %c0_34, %c0_35] : memref<3x32x32xf32, #tpu.memory_space<vmem>>, vector<1x32x32xf32>
    %49 = vector.shape_cast %48 : vector<1x32x32xf32> to vector<32x32xf32>
    %cst_36 = arith.constant dense<0.000000e+00> : vector<8x32xf32>
    %50 = tpu.matmul %33, %49, %cst_36 {dimension_numbers = #tpu.dot_dimension_numbers<[1], [0], [0], [1], [0, 0, 1, 1], [], []>} : vector<8x32xf32>, vector<32x32xf32>, vector<8x32xf32> -> vector<8x32xf32>
    %51 = arith.addf %47, %50 : vector<8x32xf32>
    %c1_37 = arith.constant 1 : index
    %c0_38 = arith.constant 0 : index
    %c0_39 = arith.constant 0 : index
    %52 = vector.load %arg10[%c1_37, %c0_38, %c0_39] : memref<3x1x32xf32, #tpu.memory_space<vmem>>, vector<1x1x32xf32>
    %53 = vector.shape_cast %52 : vector<1x1x32xf32> to vector<1x32xf32>
    %54 = vector.broadcast %53 : vector<1x32xf32> to vector<8x32xf32>
    %55 = arith.addf %51, %54 : vector<8x32xf32>
    %c2 = arith.constant 2 : index
    %c0_40 = arith.constant 0 : index
    %c0_41 = arith.constant 0 : index
    %56 = vector.load %arg7[%c2, %c0_40, %c0_41] : memref<3x16x32xf32, #tpu.memory_space<vmem>>, vector<1x16x32xf32>
    %57 = vector.shape_cast %56 : vector<1x16x32xf32> to vector<16x32xf32>
    %cst_42 = arith.constant dense<0.000000e+00> : vector<8x32xf32>
    %58 = tpu.matmul %0, %57, %cst_42 {dimension_numbers = #tpu.dot_dimension_numbers<[1], [0], [0], [1], [0, 0, 1, 1], [], []>} : vector<8x16xf32>, vector<16x32xf32>, vector<8x32xf32> -> vector<8x32xf32>
    %c2_43 = arith.constant 2 : index
    %c0_44 = arith.constant 0 : index
    %c0_45 = arith.constant 0 : index
    %59 = vector.load %arg8[%c2_43, %c0_44, %c0_45] : memref<3x32x32xf32, #tpu.memory_space<vmem>>, vector<1x32x32xf32>
    %60 = vector.shape_cast %59 : vector<1x32x32xf32> to vector<32x32xf32>
    %cst_46 = arith.constant dense<0.000000e+00> : vector<8x32xf32>
    %61 = tpu.matmul %33, %60, %cst_46 {dimension_numbers = #tpu.dot_dimension_numbers<[1], [0], [0], [1], [0, 0, 1, 1], [], []>} : vector<8x32xf32>, vector<32x32xf32>, vector<8x32xf32> -> vector<8x32xf32>
    %62 = arith.addf %58, %61 : vector<8x32xf32>
    %c2_47 = arith.constant 2 : index
    %c0_48 = arith.constant 0 : index
    %c0_49 = arith.constant 0 : index
    %63 = vector.load %arg10[%c2_47, %c0_48, %c0_49] : memref<3x1x32xf32, #tpu.memory_space<vmem>>, vector<1x1x32xf32>
    %64 = vector.shape_cast %63 : vector<1x1x32xf32> to vector<1x32xf32>
    %65 = vector.broadcast %64 : vector<1x32xf32> to vector<8x32xf32>
    %66 = arith.addf %62, %65 : vector<8x32xf32>
    %c0_50 = arith.constant 0 : index
    %c0_51 = arith.constant 0 : index
    %c0_52 = arith.constant 0 : index
    %67 = vector.load %arg9[%c0_50, %c0_51, %c0_52] : memref<3x32x32xf32, #tpu.memory_space<vmem>>, vector<1x32x32xf32>
    %68 = vector.shape_cast %67 : vector<1x32x32xf32> to vector<32x32xf32>
    %cst_53 = arith.constant dense<0.000000e+00> : vector<8x32xf32>
    %69 = tpu.matmul %2, %68, %cst_53 {dimension_numbers = #tpu.dot_dimension_numbers<[1], [0], [0], [1], [0, 0, 1, 1], [], []>} : vector<8x32xf32>, vector<32x32xf32>, vector<8x32xf32> -> vector<8x32xf32>
    %c0_54 = arith.constant 0 : index
    %c0_55 = arith.constant 0 : index
    %c0_56 = arith.constant 0 : index
    %70 = vector.load %arg11[%c0_54, %c0_55, %c0_56] : memref<3x1x32xf32, #tpu.memory_space<vmem>>, vector<1x1x32xf32>
    %71 = vector.shape_cast %70 : vector<1x1x32xf32> to vector<1x32xf32>
    %72 = vector.broadcast %71 : vector<1x32xf32> to vector<8x32xf32>
    %73 = arith.addf %69, %72 : vector<8x32xf32>
    %c1_57 = arith.constant 1 : index
    %c0_58 = arith.constant 0 : index
    %c0_59 = arith.constant 0 : index
    %74 = vector.load %arg9[%c1_57, %c0_58, %c0_59] : memref<3x32x32xf32, #tpu.memory_space<vmem>>, vector<1x32x32xf32>
    %75 = vector.shape_cast %74 : vector<1x32x32xf32> to vector<32x32xf32>
    %cst_60 = arith.constant dense<0.000000e+00> : vector<8x32xf32>
    %76 = tpu.matmul %2, %75, %cst_60 {dimension_numbers = #tpu.dot_dimension_numbers<[1], [0], [0], [1], [0, 0, 1, 1], [], []>} : vector<8x32xf32>, vector<32x32xf32>, vector<8x32xf32> -> vector<8x32xf32>
    %c1_61 = arith.constant 1 : index
    %c0_62 = arith.constant 0 : index
    %c0_63 = arith.constant 0 : index
    %77 = vector.load %arg11[%c1_61, %c0_62, %c0_63] : memref<3x1x32xf32, #tpu.memory_space<vmem>>, vector<1x1x32xf32>
    %78 = vector.shape_cast %77 : vector<1x1x32xf32> to vector<1x32xf32>
    %79 = vector.broadcast %78 : vector<1x32xf32> to vector<8x32xf32>
    %80 = arith.addf %76, %79 : vector<8x32xf32>
    %c2_64 = arith.constant 2 : index
    %c0_65 = arith.constant 0 : index
    %c0_66 = arith.constant 0 : index
    %81 = vector.load %arg9[%c2_64, %c0_65, %c0_66] : memref<3x32x32xf32, #tpu.memory_space<vmem>>, vector<1x32x32xf32>
    %82 = vector.shape_cast %81 : vector<1x32x32xf32> to vector<32x32xf32>
    %cst_67 = arith.constant dense<0.000000e+00> : vector<8x32xf32>
    %83 = tpu.matmul %2, %82, %cst_67 {dimension_numbers = #tpu.dot_dimension_numbers<[1], [0], [0], [1], [0, 0, 1, 1], [], []>} : vector<8x32xf32>, vector<32x32xf32>, vector<8x32xf32> -> vector<8x32xf32>
    %c2_68 = arith.constant 2 : index
    %c0_69 = arith.constant 0 : index
    %c0_70 = arith.constant 0 : index
    %84 = vector.load %arg11[%c2_68, %c0_69, %c0_70] : memref<3x1x32xf32, #tpu.memory_space<vmem>>, vector<1x1x32xf32>
    %85 = vector.shape_cast %84 : vector<1x1x32xf32> to vector<1x32xf32>
    %86 = vector.broadcast %85 : vector<1x32xf32> to vector<8x32xf32>
    %87 = arith.addf %83, %86 : vector<8x32xf32>
    %88 = arith.addf %44, %73 : vector<8x32xf32>
    %89 = arith.negf %88 : vector<8x32xf32>
    %90 = math.exp %89 : vector<8x32xf32>
    %cst_71 = arith.constant 1.000000e+00 : f32
    %91 = vector.broadcast %cst_71 : f32 to vector<8x32xf32>
    %92 = arith.addf %91, %90 : vector<8x32xf32>
    %93 = arith.divf %91, %92 : vector<8x32xf32>
    %94 = arith.addf %55, %80 : vector<8x32xf32>
    %95 = arith.negf %94 : vector<8x32xf32>
    %96 = math.exp %95 : vector<8x32xf32>
    %cst_72 = arith.constant 1.000000e+00 : f32
    %97 = vector.broadcast %cst_72 : f32 to vector<8x32xf32>
    %98 = arith.addf %97, %96 : vector<8x32xf32>
    %99 = arith.divf %97, %98 : vector<8x32xf32>
    %100 = arith.mulf %93, %87 : vector<8x32xf32>
    %101 = arith.addf %66, %100 : vector<8x32xf32>
    %102 = math.tanh %101 : vector<8x32xf32>
    %cst_73 = arith.constant 1.000000e+00 : f32
    %103 = vector.broadcast %cst_73 : f32 to vector<8x32xf32>
    %104 = arith.subf %103, %99 : vector<8x32xf32>
    %105 = arith.mulf %104, %102 : vector<8x32xf32>
    %106 = arith.mulf %99, %2 : vector<8x32xf32>
    %107 = arith.addf %105, %106 : vector<8x32xf32>
    %c0_74 = arith.constant 0 : index
    %c0_75 = arith.constant 0 : index
    %108 = vector.load %arg12[%c0_74, %c0_75] : memref<32x128xf32, #tpu.memory_space<vmem>>, vector<32x128xf32>
    %cst_76 = arith.constant dense<0.000000e+00> : vector<8x128xf32>
    %109 = tpu.matmul %107, %108, %cst_76 {dimension_numbers = #tpu.dot_dimension_numbers<[1], [0], [0], [1], [0, 0, 1, 1], [], []>} : vector<8x32xf32>, vector<32x128xf32>, vector<8x128xf32> -> vector<8x128xf32>
    %c0_77 = arith.constant 0 : index
    %c0_78 = arith.constant 0 : index
    %110 = vector.load %arg13[%c0_77, %c0_78] : memref<32x128xf32, #tpu.memory_space<vmem>>, vector<32x128xf32>
    %cst_79 = arith.constant dense<0.000000e+00> : vector<8x128xf32>
    %111 = tpu.matmul %33, %110, %cst_79 {dimension_numbers = #tpu.dot_dimension_numbers<[1], [0], [0], [1], [0, 0, 1, 1], [], []>} : vector<8x32xf32>, vector<32x128xf32>, vector<8x128xf32> -> vector<8x128xf32>
    %112 = arith.addf %109, %111 : vector<8x128xf32>
    %c0_80 = arith.constant 0 : index
    %c0_81 = arith.constant 0 : index
    %113 = vector.load %arg14[%c0_80, %c0_81] : memref<16x128xf32, #tpu.memory_space<vmem>>, vector<16x128xf32>
    %cst_82 = arith.constant dense<0.000000e+00> : vector<8x128xf32>
    %114 = tpu.matmul %0, %113, %cst_82 {dimension_numbers = #tpu.dot_dimension_numbers<[1], [0], [0], [1], [0, 0, 1, 1], [], []>} : vector<8x16xf32>, vector<16x128xf32>, vector<8x128xf32> -> vector<8x128xf32>
    %115 = arith.addf %112, %114 : vector<8x128xf32>
    %c0_83 = arith.constant 0 : index
    %c0_84 = arith.constant 0 : index
    %116 = vector.load %arg15[%c0_83, %c0_84] : memref<1x128xf32, #tpu.memory_space<vmem>>, vector<1x128xf32>
    %117 = vector.broadcast %116 : vector<1x128xf32> to vector<8x128xf32>
    %118 = arith.addf %115, %117 : vector<8x128xf32>
    %c0_85 = arith.constant 0 : index
    %c0_86 = arith.constant 0 : index
    %119 = vector.load %arg16[%c0_85, %c0_86] : memref<8x128xf32, #tpu.memory_space<vmem>>, vector<8x128xf32>
    tpu.vector_store %arg16[%c0_85, %c0_86], %118 {strides = array<i32>} : memref<8x128xf32, #tpu.memory_space<vmem>>, vector<8x128xf32>,
    %c0_87 = arith.constant 0 : index
    %c0_88 = arith.constant 0 : index
    %120 = vector.load %arg17[%c0_87, %c0_88] : memref<8x32xf32, #tpu.memory_space<vmem>>, vector<8x32xf32>
    tpu.vector_store %arg17[%c0_87, %c0_88], %107 {strides = array<i32>} : memref<8x32xf32, #tpu.memory_space<vmem>>, vector<8x32xf32>,
    return
  }
}

</mosaic_0001>

<bundles_post_ra>
// kernel: decoder_forward.1
= control target key start
LH: loop header
LB: loop body
LE: loop exit
PB: predicated region body
PF: predicated region fallthrough
CT: control target
= control target key end

     0   :  { %s1956_s0 = inlined_call_operand.vmem [shape: f32[8,16], index: 0, kind: input, shape index: {}]   ;;  %s1957_s1 = inlined_call_operand.vmem [shape: f32[8,8,32], index: 1, kind: input, shape index: {}]   ;;  %s1958_s2 = inlined_call_operand.vmem [shape: f32[8,32], index: 2, kind: input, shape index: {}]   ;;  %s1959_s3 = inlined_call_operand.vmem [shape: f32[32,32], index: 3, kind: input, shape index: {}]   ;;  %s1960_s4 = inlined_call_operand.vmem [shape: f32[32,32], index: 4, kind: input, shape index: {}]   ;;  %s1961_s5 = inlined_call_operand.vmem [shape: f32[1,32], index: 5, kind: input, shape index: {}]   ;;  %s1962_s6 = inlined_call_operand.vmem [shape: f32[1,32], index: 6, kind: input, shape index: {}]   ;;  %s1963_s7 = inlined_call_operand.vmem [shape: f32[3,16,32], index: 7, kind: input, shape index: {}]   ;;  %s1964_s8 = inlined_call_operand.vmem [shape: f32[3,32,32], index: 8, kind: input, shape index: {}]   ;;  %s1965_s9 = inlined_call_operand.vmem [shape: f32[3,32,32], index: 9, kind: input, shape index: {}]   ;;  %s1966_s10 = inlined_call_operand.vmem [shape: f32[3,1,32], index: 10, kind: input, shape index: {}]   ;;  %s1967_s11 = inlined_call_operand.vmem [shape: f32[3,1,32], index: 11, kind: input, shape index: {}]   ;;  %s1968_s12 = inlined_call_operand.hbm [shape: f32[32,128], index: 12, kind: input, shape index: {}]   ;;  %s1969_s13 = inlined_call_operand.hbm [shape: f32[32,128], index: 13, kind: input, shape index: {}]   ;;  %s1970_s14 = inlined_call_operand.hbm [shape: f32[16,128], index: 14, kind: input, shape index: {}]   ;;  %s1971_s15 = inlined_call_operand.vmem [shape: f32[1,128], index: 15, kind: input, shape index: {}]   ;;  %s1972_s16 = inlined_call_operand.vmem [shape: f32[8,128], index: 16, kind: output, shape index: {0}]   ;;  %s1973_s17 = inlined_call_operand.vmem [shape: f32[8,32], index: 17, kind: output, shape index: {1}]  }
   0x1   :  { %1978 = sst [smem:[#allocation9_spill]] %s1956_s0 }
   0x2   :  { %1979 = sst [smem:[#allocation10_spill]] %s1957_s1 }
   0x3   :  { %23 = vsyncpa [#allocation3], 0 }
   0x4   :  { %24 = vsyncpa [#allocation5], 0  ;;  %s66_s26 = sshll.u32 %s1969_s13, 4  ;;  %s1400_s27 = smov [#allocation4]   ;;  %s67_s26 = int_to_ptr.hbm [resolvable:$true] %s66_s26 }
   0x5   :  { %s68_s28 = sshll.u32 %s1400_s27, 4  ;;  %s53_s30 = sshll.u32 %s1968_s12, 4  ;;  %s69_s28 = int_to_ptr.vmem [resolvable:$true] %s68_s28  ;;  %s54_s30 = int_to_ptr.hbm [resolvable:$true] %s53_s30 }
   0x6   :  { %s1401_s18 = smov 128   ;;  %s1402_s19 = smov 8  }
   0x7   :  { %74 = dma.hbm_to_vmem [thread:$0]  %s67_s26, 512, %s69_s28, [#allocation5], %s1401_s18, %s1401_s18, %s1402_s19  }
   0x8   :  { %s1403_s1 = smov [#allocation2]   ;;  %s79_s23 = sshll.u32 %s1970_s14, 4  ;;  %s80_s23 = int_to_ptr.hbm [resolvable:$true] %s79_s23 }
   0x9   :  { %s55_s20 = sshll.u32 %s1403_s1, 4  ;;  %s1404_s13 = smov [#allocation6]   ;;  %s56_s20 = int_to_ptr.vmem [resolvable:$true] %s55_s20 }
   0xa   :  { %61 = dma.hbm_to_vmem [thread:$0]  %s54_s30, 512, %s56_s20, [#allocation3], %s1401_s18, %s1401_s18, %s1402_s19  }
   0xb   :  { %s81_s24 = sshll.u32 %s1404_s13, 4  ;;  %s82_s24 = int_to_ptr.vmem [resolvable:$true] %s81_s24 }
   0xc   :  { %87 = dma.hbm_to_vmem [thread:$0]  %s80_s23, 256, %s82_s24, [#allocation5], %s1401_s18, %s1401_s18, %s1402_s19  }
   0xd   :  { %1396 = dma.done.wait [#allocation3], 512  }
   0xe   :  { %1397 = vsyncadd [#allocation3], 4294966784 }
   0xf   :  { %1398 = dma.done.wait [#allocation5], 768  }
  0x10   :  { %1399 = vsyncadd [#allocation5], 4294966528  ;;  %v115_v0 = vld [vmem:[%s1959_s3 + $0x18] sm:$0xff]  ;;  %v114_v2 = vld [vmem:[%s1959_s3 + $0x10] sm:$0xff]  ;;  %s1980_s26 = sld [smem:[#allocation10_spill]]  ;;  %vm1975_vm0 = vcmask 261120  }
  0x11   :  { %v143_v1 = vld [vmem:[%s1960_s4 + $0x18] sm:$0xff]  ;;  %132 = vmatpush.msra.mxu0 %v115_v0  ;;  %v142_v3 = vld [vmem:[%s1960_s4 + $0x10] sm:$0xff]  ;;  %v113_v4 = vld [vmem:[%s1959_s3 + $0x8] sm:$0xff]  ;;  %vm315_vm1 = vcmask 1041409   ;;  %vm317_vm2 = vcmask 1042434   ;;  %vm319_vm3 = vcmask 1043459  }
  0x12   :  { %180 = vmatpush.msra.mxu1 %v143_v1  ;;  %v141_v5 = vld [vmem:[%s1960_s4 + $0x8] sm:$0xff]  ;;  %v112_v6 = vld [vmem:[%s1959_s3] sm:$0xff]  ;;  %vm321_vm4 = vcmask 1044484   ;;  %vm323_vm5 = vcmask 1045509   ;;  %vm1977_vm6 = vcmask 1046534   ;;  %vm1976_vm7 = vcmask 1047559  }
  0x13   :  { %v140_v7 = vld [vmem:[%s1960_s4] sm:$0xff]  ;;  %133 = vmatpush.msra.mxu0 %v114_v2  ;;  %vm330_vm8 = vcmask 64512   ;;  %s1985_s4 = sld [smem:[#allocation9_spill]] }
  0x14   :  { %181 = vmatpush.msra.mxu1 %v142_v3  ;;  %v1532_v8 = vld [vmem:[%s1958_s2] sm:$0xff] }
  0x15   :  { %134 = vmatpush.msra.mxu0 %v113_v4  ;;  %v1580_v20 = vld [vmem:[%s1961_s5] ss:$0 sm:$0xff] }
  0x16   :  { %v103_v9 = vld [vmem:[%s1980_s26] sm:$0xff]  ;;  %v104_v10 = vld [vmem:[%s1980_s26 + $0x8] sm:$0xff]  ;;  %v105_v11 = vld [vmem:[%s1980_s26 + $0x10] sm:$0xff]  ;;  %182 = vmatpush.msra.mxu1 %v141_v5 }
  0x17   :  { %v106_v12 = vld [vmem:[%s1980_s26 + $0x18] sm:$0xff]  ;;  %585 = vmatpush.msra.mxu2 %v103_v9  ;;  %612 = vmatpush.msra.mxu3 %v104_v10  ;;  %v107_v13 = vld [vmem:[%s1980_s26 + $0x20] sm:$0xff]  ;;  %v1562_v15 = vld [vmem:[%s1980_s26 + $0x28] sm:$0xff] }
  0x18   :  { %135 = vmatpush.msra.mxu0 %v112_v6  ;;  %183 = vmatpush.msra.mxu1 %v140_v7  ;;  %v110_v14 = vld [vmem:[%s1980_s26 + $0x38] sm:$0xff]  ;;  %v1569_v16 = vld [vmem:[%s1980_s26 + $0x30] sm:$0xff]  ;;  %v1588_v28 = vld [vmem:[%s1962_s6] ss:$0 sm:$0xff] }
  0x19   :  { %639 = vmatpush.msrb.mxu2 %v105_v11  ;;  %666 = vmatpush.msrb.mxu3 %v106_v12 }
  0x1a   :  { %1192 = vmatmul.msk.f32.vlgmr.msra.gmra.mxu0 %vm1975_vm0, %v1532_v8  ;;  %1193 = vmatmul.msk.f32.vlgmr.msra.gmra.mxu1 %vm1975_vm0, %v103_v9 }
  0x1b   :  { %693 = vmatpush.msrb.mxu0 %v107_v13 }
  0x1d   :  { %774 = vmatpush.msra.mxu0 %v110_v14 }
  0x22   :  { %1194 = vmatmul.msk.f32.gmra.mxu1 %vm1975_vm0, %v104_v10 }
  0x2a   :  { %1195 = vmatmul.msk.f32.gmra.mxu1 %vm1975_vm0, %v105_v11 }
  0x32   :  { %1196 = vmatmul.msk.f32.gmra.mxu1 %vm1975_vm0, %v106_v12 }
  0x3a   :  { %1197 = vmatmul.msk.f32.gmra.mxu1 %vm1975_vm0, %v107_v13 }
  0x42   :  { %1198 = vmatmul.msk.f32.gmra.mxu1 %vm1975_vm0, %v1562_v15 }
  0x4a   :  { %1199 = vmatmul.msk.f32.gmra.mxu1 %vm1975_vm0, %v1569_v16 }
  0x52   :  { %1200 = vmatmul.msk.f32.gmra.mxu1 %vm1975_vm0, %v110_v14 }
  0x97   :  { %v1574_v17 = vpop.f32.mrf.mxu0  ;;  %v185_v18 = vpop.f32.mrf.mxu1 }
  0x98   :  { %v217_v19 = vperm.slane %v1574_v17, 0  ;;  %v210_v21 = vrot.slane %v1574_v17, 1  ;;  %v211_v27 = vrot.slane %v1574_v17, 2  ;;  %v212_v36 = vrot.slane %v1574_v17, 3 }
  0x99   :  { %v213_v44 = vrot.slane %v1574_v17, 4  ;;  %v214_v52 = vrot.slane %v1574_v17, 5  ;;  %v215_v62 = vrot.slane %v1574_v17, 6  ;;  %v216_v6 = vrot.slane %v1574_v17, 7 }
  0x9a   :  { %v233_v22 = vadd.f32 %v217_v19, %v185_v18  ;;  %v218_v24 = vperm.slane %v210_v21, 0  ;;  %v219_v31 = vperm.slane %v211_v27, 0  ;;  %v220_v40 = vperm.slane %v212_v36, 0 }
  0x9b   :  { %v221_v48 = vperm.slane %v213_v44, 0  ;;  %v222_v56 = vperm.slane %v214_v52, 0  ;;  %v223_v1 = vperm.slane %v215_v62, 0  ;;  %v224_v10 = vperm.slane %v216_v6, 0 }
  0x9c   :  { %v245_v23 = vadd.f32 %v1580_v20, %v233_v22 }
  0x9e   :  { %1265 = vtanh.f32 %v245_v23 }
  0x9f   :  { %v188_v25 = vpop.f32.mrf.mxu1 }
  0xa0   :  { %v234_v26 = vadd.f32 %v218_v24, %v188_v25 }
  0xa2   :  { %v246_v29 = vadd.f32 %v1580_v20, %v234_v26  ;;  %v305_v26 = vlaneseq }
  0xa4   :  { %v1266_v30 = vpop.eup %1265  ;;  %1267 = vtanh.f32 %v246_v29  ;;  %v1618_v29 = vand.u32 127, %v305_v26 }
  0xa5   :  { %v265_v32 = vmul.f32 %v1266_v30, %v1588_v28 }
  0xa7   :  { %v191_v33 = vpop.f32.mrf.mxu1  ;;  %v273_v34 = vsel %vm1975_vm0, %v265_v32, 0.0 }
  0xa8   :  { %v235_v35 = vadd.f32 %v219_v31, %v191_v33  ;;  %274 = vadd.xlane.f32.xlu0 %v273_v34 }
  0xaa   :  { %v1268_v37 = vpop.eup %1267  ;;  %v247_v38 = vadd.f32 %v1580_v20, %v235_v35 }
  0xab   :  { %v266_v39 = vmul.f32 %v1268_v37, %v1588_v28 }
  0xac   :  { %1269 = vtanh.f32 %v247_v38 }
  0xad   :  { %v276_v42 = vsel %vm1975_vm0, %v266_v39, 0.0 }
  0xaf   :  { %v194_v41 = vpop.f32.mrf.mxu1 }
  0xb0   :  { %v236_v43 = vadd.f32 %v220_v40, %v194_v41  ;;  %277 = vadd.xlane.f32.xlu0 %v276_v42 }
  0xb2   :  { %v1270_v45 = vpop.eup %1269  ;;  %v248_v46 = vadd.f32 %v1580_v20, %v236_v43 }
  0xb3   :  { %v267_v47 = vmul.f32 %v1270_v45, %v1588_v28 }
  0xb4   :  { %1271 = vtanh.f32 %v248_v46 }
  0xb5   :  { %v279_v49 = vsel %vm1975_vm0, %v267_v47, 0.0 }
  0xb6   :  { %280 = vadd.xlane.f32.xlu1 %v279_v49 }
  0xb7   :  { %v197_v50 = vpop.f32.mrf.mxu1 }
  0xb8   :  { %v237_v51 = vadd.f32 %v221_v48, %v197_v50  ;;  %v1405_v48 = vmov 0  }
  0xb9   :  { %1255 = vset.pattern.permute.xlu2 %v1405_v48  ;;  %1254 = vset.pattern.permute.xlu1 %v1405_v48 }
  0xba   :  { %v1272_v53 = vpop.eup %1271  ;;  %v249_v54 = vadd.f32 %v1580_v20, %v237_v51  ;;  %1253 = vset.pattern.permute.xlu0 %v1405_v48 }
  0xbb   :  { %v268_v55 = vmul.f32 %v1272_v53, %v1588_v28 }
  0xbc   :  { %1273 = vtanh.f32 %v249_v54 }
  0xbd   :  { %v282_v57 = vsel %vm1975_vm0, %v268_v55, 0.0 }
  0xbe   :  { %283 = vadd.xlane.f32.xlu1 %v282_v57 }
  0xbf   :  { %v200_v58 = vpop.f32.mrf.mxu1 }
  0xc0   :  { %v238_v59 = vadd.f32 %v222_v56, %v200_v58 }
  0xc2   :  { %v1274_v60 = vpop.eup %1273  ;;  %v250_v61 = vadd.f32 %v1580_v20, %v238_v59 }
  0xc3   :  { %v269_v63 = vmul.f32 %v1274_v60, %v1588_v28 }
  0xc4   :  { %1275 = vtanh.f32 %v250_v61 }
  0xc5   :  { %v285_v0 = vsel %vm1975_vm0, %v269_v63, 0.0 }
  0xc6   :  { %286 = vadd.xlane.f32.xlu2 %v285_v0 }
  0xc7   :  { %v203_v2 = vpop.f32.mrf.mxu1 }
  0xc8   :  { %v239_v3 = vadd.f32 %v223_v1, %v203_v2 }
  0xca   :  { %v1276_v4 = vpop.eup %1275  ;;  %v251_v5 = vadd.f32 %v1580_v20, %v239_v3 }
  0xcb   :  { %v270_v7 = vmul.f32 %v1276_v4, %v1588_v28 }
  0xcc   :  { %1277 = vtanh.f32 %v251_v5 }
  0xcd   :  { %v288_v9 = vsel %vm1975_vm0, %v270_v7, 0.0 }
  0xce   :  { %289 = vadd.xlane.f32.xlu2 %v288_v9 }
  0xcf   :  { %v206_v11 = vpop.f32.mrf.mxu1 }
  0xd0   :  { %v240_v12 = vadd.f32 %v224_v10, %v206_v11 }
  0xd2   :  { %v1278_v13 = vpop.eup %1277  ;;  %v252_v14 = vadd.f32 %v1580_v20, %v240_v12 }
  0xd3   :  { %v271_v18 = vmul.f32 %v1278_v13, %v1588_v28 }
  0xd4   :  { %1279 = vtanh.f32 %v252_v14 }
  0xd5   :  { %v291_v19 = vsel %vm1975_vm0, %v271_v18, 0.0 }
  0xd6   :  { %292 = vadd.xlane.f32.xlu0 %v291_v19 }
  0xda   :  { %v1280_v21 = vpop.eup %1279 }
  0xdb   :  { %v272_v17 = vmul.f32 %v1280_v21, %v1588_v28 }
  0xdd   :  { %v294_v22 = vsel %vm1975_vm0, %v272_v17, 0.0 }
  0xde   :  { %295 = vadd.xlane.f32.xlu1 %v294_v22 }
 0x11b   :  { %v275_v23 = vpop.xlane.xlu0 %274 }
 0x11c   :  { %v307_v33 = vperm.slane %v275_v23, %v1618_v29 }
 0x123   :  { %v278_v27 = vpop.xlane.xlu0 %277 }
 0x124   :  { %v308_v30 = vperm.slane %v278_v27, %v1618_v29 }
 0x126   :  { %v316_v36 = vsel %vm315_vm1, %v308_v30, %v307_v33 }
 0x129   :  { %v281_v24 = vpop.xlane.xlu1 %280 }
 0x12a   :  { %v309_v31 = vperm.slane %v281_v24, %v1618_v29 }
 0x12c   :  { %v318_v38 = vsel %vm317_vm2, %v309_v31, %v316_v36 }
 0x131   :  { %v284_v20 = vpop.xlane.xlu1 %283 }
 0x132   :  { %v310_v28 = vperm.slane %v284_v20, %v1618_v29 }
 0x134   :  { %v320_v40 = vsel %vm319_vm3, %v310_v28, %v318_v38 }
 0x139   :  { %v287_v25 = vpop.xlane.xlu2 %286 }
 0x13a   :  { %v311_v35 = vperm.slane %v287_v25, %v1618_v29 }
 0x13c   :  { %v322_v41 = vsel %vm321_vm4, %v311_v35, %v320_v40 }
 0x141   :  { %v290_v32 = vpop.xlane.xlu2 %289 }
 0x142   :  { %v312_v37 = vperm.slane %v290_v32, %v1618_v29 }
 0x144   :  { %v324_v44 = vsel %vm323_vm5, %v312_v37, %v322_v41 }
 0x149   :  { %v293_v34 = vpop.xlane.xlu0 %292 }
 0x14a   :  { %v313_v39 = vperm.slane %v293_v34, %v1618_v29 }
 0x14c   :  { %v326_v45 = vsel %vm1977_vm6, %v313_v39, %v324_v44 }
 0x151   :  { %v296_v42 = vpop.xlane.xlu1 %295 }
 0x152   :  { %v314_v43 = vperm.slane %v296_v42, %v1618_v29 }
 0x154   :  { %v328_v46 = vsel %vm1976_vm7, %v314_v43, %v326_v45 }
 0x155   :  { %v331_v47 = vsel %vm330_vm8, %v328_v46, -inf }
 0x156   :  { %332 = vmax.xlane.f32.xlu2 %v331_v47 }
 0x1c9   :  { %v333_v49 = vpop.xlane.xlu2 %332 }
 0x1ca   :  { %v337_v50 = vperm.slane %v333_v49, 2  ;;  %v336_v51 = vperm.slane %v333_v49, 1  ;;  %v335_v52 = vperm.slane %v333_v49, 0  ;;  %v338_v56 = vperm.slane %v333_v49, 3 }
 0x1cb   :  { %v339_v57 = vperm.slane %v333_v49, 4  ;;  %v342_v58 = vperm.slane %v333_v49, 7  ;;  %v340_v2 = vperm.slane %v333_v49, 5  ;;  %v341_v4 = vperm.slane %v333_v49, 6 }
 0x1cc   :  { %v353_v53 = vsub.f32 %v281_v24, %v337_v50  ;;  %v352_v54 = vsub.f32 %v278_v27, %v336_v51  ;;  %v351_v55 = vsub.f32 %v275_v23, %v335_v52  ;;  %v354_v62 = vsub.f32 %v284_v20, %v338_v56 }
 0x1cd   :  { %v355_v63 = vsub.f32 %v287_v25, %v339_v57  ;;  %v358_v0 = vsub.f32 %v296_v42, %v342_v58  ;;  %v356_v10 = vsub.f32 %v290_v32, %v340_v2  ;;  %v357_v11 = vsub.f32 %v293_v34, %v341_v4 }
 0x1ce   :  { %v363_v59 = vmul.f32 1.442695, %v353_v53  ;;  %v361_v60 = vmul.f32 1.442695, %v352_v54  ;;  %v359_v61 = vmul.f32 1.442695, %v351_v55 }
 0x1cf   :  { %v365_v1 = vmul.f32 1.442695, %v354_v62  ;;  %v367_v3 = vmul.f32 1.442695, %v355_v63  ;;  %v373_v6 = vmul.f32 1.442695, %v358_v0 }
 0x1d0   :  { %1281 = vpow2.f32 %v363_v59  ;;  %v369_v12 = vmul.f32 1.442695, %v356_v10  ;;  %v371_v13 = vmul.f32 1.442695, %v357_v11 }
 0x1d1   :  { %1283 = vpow2.f32 %v361_v60 }
 0x1d2   :  { %1285 = vpow2.f32 %v359_v61 }
 0x1d3   :  { %1287 = vpow2.f32 %v365_v1 }
 0x1d4   :  { %1289 = vpow2.f32 %v367_v3 }
 0x1d5   :  { %1291 = vpow2.f32 %v373_v6 }
 0x1d6   :  { %v1636_v5 = vpop.eup %1281  ;;  %1293 = vpow2.f32 %v369_v12 }
 0x1d7   :  { %v1638_v7 = vpop.eup %1283  ;;  %390 = vperm.xlu2 %1255, %v1636_v5   ;;  %1295 = vpow2.f32 %v371_v13 }
 0x1d8   :  { %v1641_v9 = vpop.eup %1285  ;;  %387 = vperm.xlu1 %1254, %v1638_v7  }
 0x1d9   :  { %384 = vperm.xlu0 %1253, %v1641_v9   ;;  %v1645_v14 = vpop.eup %1287 }
 0x1da   :  { %v1647_v18 = vpop.eup %1289 }
 0x1db   :  { %v1650_v19 = vpop.eup %1291 }
 0x1dc   :  { %v1654_v21 = vpop.eup %1293 }
 0x1dd   :  { %v1656_v17 = vpop.eup %1295 }
 0x1df   :  { %393 = vperm.xlu2 %1255, %v1645_v14  }
 0x1e0   :  { %396 = vperm.xlu1 %1254, %v1647_v18  }
 0x1e1   :  { %405 = vperm.xlu0 %1253, %v1650_v19  }
 0x1e7   :  { %399 = vperm.xlu2 %1255, %v1654_v21  }
 0x1e8   :  { %402 = vperm.xlu1 %1254, %v1656_v17  }
 0x231   :  { %v391_v22 = vpop.permute.xlu2 %390 }
 0x232   :  { %v409_v31 = vperm.slane %v391_v22, %v1618_v29 }
 0x239   :  { %v394_v25 = vpop.permute.xlu2 %393 }
 0x23a   :  { %v410_v28 = vperm.slane %v394_v25, %v1618_v29 }
 0x241   :  { %v400_v34 = vpop.permute.xlu2 %399 }
 0x242   :  { %v412_v38 = vperm.slane %v400_v34, %v1618_v29 }
 0x24a   :  { %v388_v23 = vpop.permute.xlu1 %387 }
 0x24b   :  { %v385_v24 = vpop.permute.xlu0 %384  ;;  %v408_v26 = vperm.slane %v388_v23, %v1618_v29 }
 0x24c   :  { %v407_v27 = vperm.slane %v385_v24, %v1618_v29 }
 0x24e   :  { %v415_v20 = vsel %vm315_vm1, %v408_v26, %v407_v27 }
 0x24f   :  { %v416_v32 = vsel %vm317_vm2, %v409_v31, %v415_v20 }
 0x250   :  { %v417_v35 = vsel %vm319_vm3, %v410_v28, %v416_v32 }
 0x252   :  { %v397_v30 = vpop.permute.xlu1 %396 }
 0x253   :  { %v411_v33 = vperm.slane %v397_v30, %v1618_v29  ;;  %v406_v37 = vpop.permute.xlu0 %405 }
 0x254   :  { %v414_v41 = vperm.slane %v406_v37, %v1618_v29 }
 0x255   :  { %v418_v36 = vsel %vm321_vm4, %v411_v33, %v417_v35 }
 0x256   :  { %v419_v42 = vsel %vm323_vm5, %v412_v38, %v418_v36 }
 0x25a   :  { %v403_v39 = vpop.permute.xlu1 %402 }
 0x25b   :  { %v413_v40 = vperm.slane %v403_v39, %v1618_v29 }
 0x25d   :  { %v420_v43 = vsel %vm1977_vm6, %v413_v40, %v419_v42 }
 0x25e   :  { %v421_v44 = vsel %vm1976_vm7, %v414_v41, %v420_v43 }
 0x25f   :  { %v423_v45 = vsel %vm330_vm8, %v421_v44, 0.0 }
 0x260   :  { %424 = vadd.xlane.f32.xlu2 %v423_v45 }
 0x2d3   :  { %v425_v46 = vpop.xlane.xlu2 %424 }
 0x2d4   :  { %v427_v47 = vperm.slane %v425_v46, 0  ;;  %v428_v48 = vperm.slane %v425_v46, 1  ;;  %v1676_v49 = vperm.slane %v425_v46, 2  ;;  %v1678_v50 = vperm.slane %v425_v46, 3 }
 0x2d5   :  { %v1680_v51 = vperm.slane %v425_v46, 4  ;;  %v1682_v52 = vperm.slane %v425_v46, 5  ;;  %v1688_v57 = vperm.slane %v425_v46, 7  ;;  %v1690_v60 = vperm.slane %v425_v46, 6 }
 0x2d6   :  { %1297 = vrcp.f32 %v427_v47  ;;  %v467_v53 = vand.u32 2147483647, %v428_v48  ;;  %v469_v54 = vand.u32 2147483648, %v428_v48  ;;  %v452_v55 = vand.u32 2147483647, %v427_v47 }
 0x2d7   :  { %1299 = vrcp.f32 %v428_v48  ;;  %v454_v58 = vand.u32 2147483648, %v427_v47  ;;  %vm463_vm9 = vweird.f32 %v428_v48  ;;  %vm448_vm11 = vweird.f32 %v427_v47 }
 0x2d8   :  { %1301 = vrcp.f32 %v1676_v49  ;;  %vm1694_vm10 = vcmp.eq.f32.partialorder %v467_v53, 8.507059e+37  ;;  %v470_v2 = vor.u32 1.1754944e-38, %v469_v54  ;;  %vm1700_vm12 = vcmp.eq.f32.partialorder %v452_v55, 8.507059e+37 }
 0x2d9   :  { %1303 = vrcp.f32 %v1678_v50  ;;  %v455_v12 = vor.u32 1.1754944e-38, %v454_v58  ;;  %v499_v31 = vand.u32 2147483648, %v1678_v50  ;;  %v484_v33 = vand.u32 2147483648, %v1676_v49 }
 0x2da   :  { %1305 = vrcp.f32 %v1680_v51  ;;  %v482_v45 = vand.u32 2147483647, %v1676_v49  ;;  %v529_v58 = vand.u32 2147483648, %v1682_v52  ;;  %v514_v0 = vand.u32 2147483648, %v1680_v51 }
 0x2db   :  { %1307 = vrcp.f32 %v1682_v52  ;;  %v500_v55 = vor.u32 1.1754944e-38, %v499_v31  ;;  %v557_v31 = vand.u32 2147483647, %v1688_v57 }
 0x2dc   :  { %v1298_v56 = vpop.eup %1297  ;;  %1309 = vrcp.f32 %v1688_v57 }
 0x2dd   :  { %v1300_v59 = vpop.eup %1299  ;;  %v444_v61 = vmul.f32 %v1298_v56, %v427_v47  ;;  %vm449_vm13 = vweird.f32 %v1298_v56  ;;  %1311 = vrcp.f32 %v1690_v60  ;;  %v497_v47 = vand.u32 2147483647, %v1678_v50 }
 0x2de   :  { %v1692_v62 = vpop.eup %1301  ;;  %v459_v63 = vmul.f32 %v1300_v59, %v428_v48  ;;  %vm464_vm14 = vweird.f32 %v1300_v59  ;;  %vm450_vm15 = vmor %vm448_vm11, %vm449_vm13  ;;  %vm493_vm11 = vweird.f32 %v1678_v50 }
 0x2df   :  { %v1698_v1 = vpop.eup %1303  ;;  %v445_v3 = vsub.f32 1.0, %v444_v61  ;;  %v474_v6 = vmul.f32 %v1692_v62, %v1676_v49  ;;  %vm479_vm0 = vweird.f32 %v1692_v62  ;;  %vm465_vm7 = vmor %vm463_vm9, %vm464_vm14  ;;  %vm478_vm9 = vweird.f32 %v1676_v49 }
 0x2e0   :  { %v1706_v10 = vpop.eup %1305  ;;  %v460_v11 = vsub.f32 1.0, %v459_v63  ;;  %v489_v13 = vmul.f32 %v1698_v1, %v1678_v50  ;;  %vm494_vm6 = vweird.f32 %v1698_v1  ;;  %v485_v49 = vor.u32 1.1754944e-38, %v484_v33 }
 0x2e1   :  { %v1711_v22 = vpop.eup %1307  ;;  %v446_v23 = vmul.f32 %v1298_v56, %v445_v3  ;;  %v475_v24 = vsub.f32 1.0, %v474_v6  ;;  %v504_v25 = vmul.f32 %v1706_v10, %v1680_v51  ;;  %vm508_vm14 = vweird.f32 %v1680_v51 }
 0x2e2   :  { %v461_v26 = vmul.f32 %v1300_v59, %v460_v11  ;;  %v490_v27 = vsub.f32 1.0, %v489_v13  ;;  %v519_v20 = vmul.f32 %v1711_v22, %v1682_v52  ;;  %v1727_v38 = vpop.eup %1309  ;;  %vm524_vm13 = vweird.f32 %v1711_v22 }
 0x2e3   :  { %v447_v30 = vadd.f32 %v1298_v56, %v446_v23  ;;  %v476_v32 = vmul.f32 %v1692_v62, %v475_v24  ;;  %v505_v37 = vsub.f32 1.0, %v504_v25  ;;  %v1746_v53 = vpop.eup %1311  ;;  %v549_v50 = vmul.f32 %v1727_v38, %v1688_v57 }
 0x2e4   :  { %v462_v28 = vadd.f32 %v1300_v59, %v461_v26  ;;  %v491_v34 = vmul.f32 %v1698_v1, %v490_v27  ;;  %v520_v42 = vsub.f32 1.0, %v519_v20  ;;  %v512_v3 = vand.u32 2147483647, %v1680_v51 }
 0x2e5   :  { %v451_v35 = vsel %vm450_vm15, %v1298_v56, %v447_v30  ;;  %v477_v36 = vadd.f32 %v1692_v62, %v476_v32  ;;  %vm523_vm15 = vweird.f32 %v1682_v52  ;;  %v527_v11 = vand.u32 2147483647, %v1682_v52 }
 0x2e6   :  { %v466_v39 = vsel %vm465_vm7, %v1300_v59, %v462_v28  ;;  %v456_v40 = vsel %vm1700_vm12, %v455_v12, %v451_v35  ;;  %v492_v41 = vadd.f32 %v1698_v1, %v491_v34  ;;  %vm480_vm7 = vmor %vm478_vm9, %vm479_vm0  ;;  %v521_v54 = vmul.f32 %v1711_v22, %v520_v42 }
 0x2e7   :  { %v471_v43 = vsel %vm1694_vm10, %v470_v2, %v466_v39  ;;  %v457_v44 = vmul.f32 %v1641_v9, %v456_v40  ;;  %vm495_vm12 = vmor %vm493_vm11, %vm494_vm6  ;;  %v481_v48 = vsel %vm480_vm7, %v1692_v62, %v477_v36  ;;  %v506_v9 = vmul.f32 %v1706_v10, %v505_v37 }
 0x2e8   :  { %v472_v46 = vmul.f32 %v1638_v7, %v471_v43  ;;  %v496_v7 = vsel %vm495_vm12, %v1698_v1, %v492_v41  ;;  %vm483_vm0 = vcmp.eq.f32.partialorder %v482_v45, 8.507059e+37  ;;  %vm498_vm10 = vcmp.eq.f32.partialorder %v497_v47, 8.507059e+37  ;;  %vm525_vm11 = vmor %vm523_vm15, %vm524_vm13  ;;  %v780_v47 = vld [vmem:[%s1963_s7 + $0x8] sm:$0xff] }
 0x2e9   :  { %565 = vperm.xlu1 %1254, %v457_v44   ;;  %v486_v56 = vsel %vm483_vm0, %v485_v49, %v481_v48  ;;  %v501_v59 = vsel %vm498_vm10, %v500_v55, %v496_v7  ;;  %v507_v61 = vadd.f32 %v1706_v10, %v506_v9  ;;  %vm509_vm6 = vweird.f32 %v1706_v10  ;;  %v779_v48 = vld [vmem:[%s1963_s7] sm:$0xff]  ;;  %v784_v9 = vld [vmem:[%s1964_s8 + $0x18] sm:$0xff]  ;;  %v783_v49 = vld [vmem:[%s1964_s8 + $0x10] sm:$0xff] }
 0x2ea   :  { %592 = vperm.xlu0 %1253, %v472_v46   ;;  %v534_v62 = vmul.f32 %v1746_v53, %v1690_v60  ;;  %v522_v63 = vadd.f32 %v1711_v22, %v521_v54  ;;  %v550_v1 = vsub.f32 1.0, %v549_v50  ;;  %v487_v2 = vmul.f32 %v1636_v5, %v486_v56  ;;  %vm510_vm9 = vmor %vm508_vm14, %vm509_vm6  ;;  %v1225_v7 = vld [vmem:[%s1964_s8 + $0x58] sm:$0xff]  ;;  %v1215_v54 = vld [vmem:[%s1964_s8 + $0x30] sm:$0xff] }
 0x2eb   :  { %v502_v6 = vmul.f32 %v1645_v14, %v501_v59  ;;  %v511_v12 = vsel %vm510_vm9, %v1706_v10, %v507_v61  ;;  %v515_v23 = vor.u32 1.1754944e-38, %v514_v0  ;;  %v530_v24 = vor.u32 1.1754944e-38, %v529_v58  ;;  %v1224_v50 = vld [vmem:[%s1964_s8 + $0x50] sm:$0xff]  ;;  %v782_v55 = vld [vmem:[%s1964_s8 + $0x8] sm:$0xff]  ;;  %v781_v59 = vld [vmem:[%s1964_s8] sm:$0xff] }
 0x2ec   :  { %v535_v4 = vsub.f32 1.0, %v534_v62  ;;  %v526_v5 = vsel %vm525_vm11, %v1711_v22, %v522_v63  ;;  %v551_v51 = vmul.f32 %v1727_v38, %v550_v1  ;;  %vm513_vm7 = vcmp.eq.f32.partialorder %v512_v3, 8.507059e+37  ;;  %v1214_v56 = vld [vmem:[%s1964_s8 + $0x28] sm:$0xff]  ;;  %v1213_v61 = vld [vmem:[%s1964_s8 + $0x20] sm:$0xff]  ;;  %v1212_v63 = vld [vmem:[%s1963_s7 + $0x18] sm:$0xff] }
 0x2ed   :  { %vm528_vm12 = vcmp.eq.f32.partialorder %v527_v11, 8.507059e+37  ;;  %v516_v14 = vsel %vm513_vm7, %v515_v23, %v511_v12  ;;  %vm539_vm0 = vweird.f32 %v1746_v53  ;;  %vm554_vm10 = vweird.f32 %v1727_v38  ;;  %v1223_v58 = vld [vmem:[%s1964_s8 + $0x48] sm:$0xff]  ;;  %v1222_v62 = vld [vmem:[%s1964_s8 + $0x40] sm:$0xff]  ;;  %v1233_v0 = vld [vmem:[%s1965_s9 + $0x38] sm:$0xff] }
 0x2ee   :  { %v536_v13 = vmul.f32 %v1746_v53, %v535_v4  ;;  %v531_v25 = vsel %vm528_vm12, %v530_v24, %v526_v5  ;;  %v552_v26 = vadd.f32 %v1727_v38, %v551_v51  ;;  %v544_v10 = vand.u32 2147483648, %v1690_v60  ;;  %v1221_v1 = vld [vmem:[%s1963_s7 + $0x28] sm:$0xff]  ;;  %v1211_v3 = vld [vmem:[%s1963_s7 + $0x10] sm:$0xff] }
 0x2ef   :  { %v517_v22 = vmul.f32 %v1647_v18, %v516_v14  ;;  %v559_v27 = vand.u32 2147483648, %v1688_v57  ;;  %vm538_vm6 = vweird.f32 %v1690_v60  ;;  %v542_v20 = vand.u32 2147483647, %v1690_v60  ;;  %v1232_v4 = vld [vmem:[%s1965_s9 + $0x30] sm:$0xff]  ;;  %v1231_v11 = vld [vmem:[%s1965_s9 + $0x28] sm:$0xff] }
 0x2f0   :  { %v537_v52 = vadd.f32 %v1746_v53, %v536_v13  ;;  %v532_v30 = vmul.f32 %v1654_v21, %v531_v25  ;;  %vm553_vm13 = vweird.f32 %v1688_v57  ;;  %vm540_vm14 = vmor %vm538_vm6, %vm539_vm0  ;;  %v545_v33 = vor.u32 1.1754944e-38, %v544_v10  ;;  %v1230_v13 = vld [vmem:[%s1965_s9 + $0x20] sm:$0xff] }
 0x2f1   :  { %619 = vperm.xlu1 %1254, %v487_v2   ;;  %vm555_vm15 = vmor %vm553_vm13, %vm554_vm10  ;;  %v560_v28 = vor.u32 1.1754944e-38, %v559_v27  ;;  %vm543_vm9 = vcmp.eq.f32.partialorder %v542_v20, 8.507059e+37  ;;  %vm558_vm11 = vcmp.eq.f32.partialorder %v557_v31, 8.507059e+37  ;;  %vm1986_vm7 = vcmask 1046534  }
 0x2f2   :  { %646 = vperm.xlu0 %1253, %v502_v6   ;;  %v541_v32 = vsel %vm540_vm14, %v1746_v53, %v537_v52  ;;  %v556_v18 = vsel %vm555_vm15, %v1727_v38, %v552_v26  ;;  %v1216_v53 = vld [vmem:[%s1964_s8 + $0x38] sm:$0xff]  ;;  %v1220_v6 = vld [vmem:[%s1963_s7 + $0x20] sm:$0xff] }
 0x2f3   :  { %v546_v34 = vsel %vm543_vm9, %v545_v33, %v541_v32  ;;  %v561_v60 = vsel %vm558_vm11, %v560_v28, %v556_v18 }
 0x2f4   :  { %v547_v21 = vmul.f32 %v1656_v17, %v546_v34  ;;  %v562_v35 = vmul.f32 %v1650_v19, %v561_v60  ;;  %v969_v60 = vld [vmem:[%s1965_s9 + $0x18] sm:$0xff] }
 0x2f9   :  { %673 = vperm.xlu1 %1254, %v517_v22  }
 0x2fa   :  { %700 = vperm.xlu0 %1253, %v532_v30  }
 0x301   :  { %727 = vperm.xlu1 %1254, %v547_v21  }
 0x302   :  { %754 = vperm.xlu0 %1253, %v562_v35   ;;  %v1239_v35 = vld [vmem:[%s1965_s9 + $0x58] sm:$0xff] }
 0x35b   :  { %v566_v57 = vpop.permute.xlu1 %565 }
 0x35c   :  { %v593_v36 = vpop.permute.xlu0 %592  ;;  %v567_v37 = vperm.slane %v566_v57, %v1618_v29  ;;  %v968_v57 = vld [vmem:[%s1965_s9 + $0x10] sm:$0xff] }
 0x35d   :  { %v594_v39 = vperm.slane %v593_v36, %v1618_v29  ;;  %v1238_v36 = vld [vmem:[%s1965_s9 + $0x50] sm:$0xff] }
 0x35e   :  { %1201 = vmatmul.msk.f32.vlgmr.msra.gmra.mxu2 %vm330_vm8, %v567_v37  ;;  %v967_v37 = vld [vmem:[%s1965_s9 + $0x8] sm:$0xff] }
 0x35f   :  { %1202 = vmatmul.msk.f32.vlgmr.msra.gmra.mxu3 %vm330_vm8, %v594_v39  ;;  %720 = vmatpush.msra.mxu2 %v1562_v15  ;;  %v1237_v39 = vld [vmem:[%s1965_s9 + $0x48] sm:$0xff] }
 0x360   :  { %747 = vmatpush.msra.mxu3 %v1569_v16 }
 0x363   :  { %v620_v38 = vpop.permute.xlu1 %619 }
 0x364   :  { %v647_v17 = vpop.permute.xlu0 %646  ;;  %v621_v19 = vperm.slane %v620_v38, %v1618_v29  ;;  %v966_v38 = vld [vmem:[%s1965_s9] sm:$0xff] }
 0x365   :  { %v648_v40 = vperm.slane %v647_v17, %v1618_v29  ;;  %v1108_v17 = vld [vmem:[#allocation4 + $0x18] sm:$0xff] }
 0x366   :  { %1203 = vmatmul.msk.f32.vlgmr.msrb.gmra.mxu2 %vm330_vm8, %v621_v19  ;;  %v1236_v19 = vld [vmem:[%s1965_s9 + $0x40] sm:$0xff] }
 0x367   :  { %1204 = vmatmul.msk.f32.vlgmr.msrb.gmra.mxu3 %vm330_vm8, %v648_v40  ;;  %821 = vmatpush.msrb.mxu2 %v784_v9  ;;  %v1107_v40 = vld [vmem:[#allocation4 + $0x10] sm:$0xff] }
 0x368   :  { %847 = vmatpush.msrb.mxu3 %v780_v47 }
 0x369   :  { %822 = vmatpush.msrb.mxu2 %v783_v49  ;;  %v1258_v49 = vld [vmem:[%s1966_s10] ss:$0 sm:$0xff] }
 0x36a   :  { %848 = vmatpush.msrb.mxu3 %v779_v48 }
 0x36b   :  { %v674_v41 = vpop.permute.xlu1 %673  ;;  %823 = vmatpush.msrb.mxu2 %v782_v55 }
 0x36c   :  { %v701_v42 = vpop.permute.xlu0 %700  ;;  %v675_v43 = vperm.slane %v674_v41, %v1618_v29  ;;  %v1106_v41 = vld [vmem:[#allocation4 + $0x8] sm:$0xff] }
 0x36d   :  { %v702_v44 = vperm.slane %v701_v42, %v1618_v29  ;;  %824 = vmatpush.msrb.mxu2 %v781_v59  ;;  %v1105_v42 = vld [vmem:[#allocation4] sm:$0xff] }
 0x36e   :  { %1205 = vmatmul.msk.f32.vlgmr.msrb.gmra.mxu0 %vm330_vm8, %v675_v43 }
 0x36f   :  { %1206 = vmatmul.msk.f32.vlgmr.msra.gmra.mxu2 %vm330_vm8, %v702_v44  ;;  %878 = vmatpush.msrb.mxu0 %v1216_v53 }
 0x370   :  { %900 = vmatpush.msra.mxu2 %v1212_v63 }
 0x371   :  { %879 = vmatpush.msrb.mxu0 %v1215_v54 }
 0x372   :  { %901 = vmatpush.msra.mxu2 %v1211_v3 }
 0x373   :  { %v728_v15 = vpop.permute.xlu1 %727  ;;  %880 = vmatpush.msrb.mxu0 %v1214_v56 }
 0x374   :  { %v755_v16 = vpop.permute.xlu0 %754  ;;  %v729_v45 = vperm.slane %v728_v15, %v1618_v29 }
 0x375   :  { %v756_v46 = vperm.slane %v755_v16, %v1618_v29  ;;  %v1816_v29 = vld [vmem:[%s1985_s4] sm:$0xff]  ;;  %881 = vmatpush.msrb.mxu0 %v1213_v61 }
 0x376   :  { %1207 = vmatmul.msk.f32.vlgmr.msra.gmra.mxu3 %vm330_vm8, %v729_v45  ;;  %v1261_v16 = vld [vmem:[%s1967_s11 + $0x1] ss:$0 sm:$0xff] }
 0x377   :  { %1208 = vmatmul.msk.f32.vlgmr.msra.gmra.mxu0 %vm330_vm8, %v756_v46  ;;  %vm829_vm8 = vcmask 130048   ;;  %932 = vmatpush.msra.mxu3 %v1225_v7  ;;  %v1260_v45 = vld [vmem:[%s1966_s10 + $0x1] ss:$0 sm:$0xff] }
 0x378   :  { %954 = vmatpush.msra.mxu0 %v1221_v1  ;;  %v1104_v1 = vld [vmem:[#allocation2 + $0x18] sm:$0xff] }
 0x379   :  { %933 = vmatpush.msra.mxu3 %v1224_v50  ;;  %v1262_v50 = vld [vmem:[%s1967_s11] ss:$0 sm:$0xff] }
 0x37a   :  { %955 = vmatpush.msra.mxu0 %v1220_v6  ;;  %v1102_v6 = vld [vmem:[#allocation2 + $0x8] sm:$0xff] }
 0x37b   :  { %934 = vmatpush.msra.mxu3 %v1223_v58 }
 0x37d   :  { %935 = vmatpush.msra.mxu3 %v1222_v62 }
 0x37e   :  { %1210 = vmatmul.msk.f32.vlgmr.msrb.gmra.mxu3 %vm829_vm8, %v1816_v29 }
 0x37f   :  { %1016 = vmatpush.msrb.mxu3 %v1233_v0 }
 0x381   :  { %1017 = vmatpush.msrb.mxu3 %v1232_v4 }
 0x383   :  { %1018 = vmatpush.msrb.mxu3 %v1231_v11  ;;  %v1101_v11 = vld [vmem:[#allocation2] sm:$0xff] }
 0x385   :  { %1019 = vmatpush.msrb.mxu3 %v1230_v13  ;;  %v1152_v13 = vld [vmem:[#allocation6] sm:$0xff] }
 0x3e1   :  { %v587_v2 = vpop.f32.mrf.mxu2 }
 0x3e2   :  { %v614_v12 = vpop.f32.mrf.mxu3 }
 0x3e3   :  { %v793_v51 = vrot.slane %v614_v12, 7  ;;  %v1153_v12 = vld [vmem:[#allocation6 + $0x8] sm:$0xff] }
 0x3e5   :  { %v794_v25 = vsel %vm315_vm1, %v793_v51, %v587_v2  ;;  %vm1987_vm1 = vcmask 1047559   ;;  %v1103_v2 = vld [vmem:[#allocation2 + $0x10] sm:$0xff] }
 0x3e9   :  { %v641_v5 = vpop.f32.mrf.mxu2 }
 0x3ea   :  { %v795_v24 = vrot.slane %v641_v5, 6  ;;  %v668_v14 = vpop.f32.mrf.mxu3 }
 0x3eb   :  { %v695_v23 = vpop.f32.mrf.mxu0  ;;  %v797_v52 = vrot.slane %v668_v14, 5 }
 0x3ec   :  { %v796_v26 = vsel %vm317_vm2, %v795_v24, %v794_v25  ;;  %v799_v22 = vrot.slane %v695_v23, 4  ;;  %vm1988_vm2 = vcmask 261120  }
 0x3ed   :  { %v798_v27 = vsel %vm319_vm3, %v797_v52, %v796_v26  ;;  %vm1989_vm3 = vmmov %vm1988_vm2  ;;  %v1263_v52 = vld [vmem:[%s1967_s11 + $0x2] ss:$0 sm:$0xff] }
 0x3ee   :  { %v800_v32 = vsel %vm321_vm4, %v799_v22, %v798_v27  ;;  %vm1990_vm4 = vmmov %vm1988_vm2 }
 0x3ef   :  { %vm1992_vm12 = vmmov %vm1988_vm2 }
 0x3f0   :  { %vm1993_vm0 = vmmov %vm1988_vm2 }
 0x3f1   :  { %vm1994_vm10 = vmmov %vm1993_vm0 }
 0x3f2   :  { %v722_v10 = vpop.f32.mrf.mxu2 }
 0x3f3   :  { %v801_v20 = vrot.slane %v722_v10, 3 }
 0x3f4   :  { %v776_v30 = vpop.f32.mrf.mxu0 }
 0x3f5   :  { %v802_v33 = vsel %vm323_vm5, %v801_v20, %v800_v32  ;;  %v805_v28 = vrot.slane %v776_v30, 1  ;;  %vm1991_vm5 = vmmov %vm1988_vm2  ;;  %v1259_v32 = vld [vmem:[%s1966_s10 + $0x2] ss:$0 sm:$0xff] }
 0x3f9   :  { %v749_v31 = vpop.f32.mrf.mxu3 }
 0x3fa   :  { %v803_v18 = vrot.slane %v749_v31, 2 }
 0x3fc   :  { %v804_v34 = vsel %vm1986_vm7, %v803_v18, %v802_v33 }
 0x3fd   :  { %v806_v21 = vsel %vm1987_vm1, %v805_v28, %v804_v34  ;;  %vm1995_vm1 = vmmov %vm1993_vm0 }
 0x3fe   :  { %1209 = vmatmul.msk.f32.vlgmr.msrb.gmra.mxu2 %vm1988_vm2, %v806_v21  ;;  %1217 = vmatmul.msk.f32.vlgmr.msrb.gmra.mxu0 %vm1989_vm3, %v806_v21  ;;  %vm1996_vm2 = vmmov %vm1993_vm0 }
 0x3ff   :  { %1226 = vmatmul.msk.f32.vlgmr.msra.gmra.mxu3 %vm1990_vm4, %v806_v21  ;;  %986 = vmatpush.msrb.mxu2 %v969_v60 }
 0x400   :  { %1046 = vmatpush.msrb.mxu0 %v1239_v35  ;;  %1144 = vmatpush.msra.mxu3 %v1104_v1 }
 0x401   :  { %987 = vmatpush.msrb.mxu2 %v968_v57  ;;  %v850_v43 = vpop.f32.mrf.mxu3 }
 0x402   :  { %1047 = vmatpush.msrb.mxu0 %v1238_v36  ;;  %1145 = vmatpush.msra.mxu3 %v1103_v2 }
 0x403   :  { %988 = vmatpush.msrb.mxu2 %v967_v37 }
 0x404   :  { %1048 = vmatpush.msrb.mxu0 %v1237_v39  ;;  %1146 = vmatpush.msra.mxu3 %v1102_v6 }
 0x405   :  { %989 = vmatpush.msrb.mxu2 %v966_v38 }
 0x406   :  { %1218 = vmatmul.msk.f32.vlgmr.msra.gmra.mxu2 %vm829_vm8, %v1816_v29  ;;  %1227 = vmatmul.msk.f32.vlgmr.msra.gmra.mxu0 %vm829_vm8, %v1816_v29 }
 0x407   :  { %1235 = vmatmul.msk.f32.vlgmr.msrb.gmra.mxu3 %vm1991_vm5, %v1532_v8  ;;  %1121 = vmatpush.msra.mxu2 %v1108_v17 }
 0x408   :  { %1049 = vmatpush.msrb.mxu0 %v1236_v19  ;;  %1147 = vmatpush.msra.mxu3 %v1101_v11 }
 0x409   :  { %1122 = vmatpush.msra.mxu2 %v1107_v40 }
 0x40a   :  { %1168 = vmatpush.msra.mxu0 %v1153_v12 }
 0x40b   :  { %1123 = vmatpush.msra.mxu2 %v1106_v41 }
 0x40c   :  { %1169 = vmatpush.msra.mxu0 %v1152_v13 }
 0x40d   :  { %1124 = vmatpush.msra.mxu2 %v1105_v42  ;;  %v1323_v42 = vld [vmem:[%s1958_s2] sm:$0xff] }
 0x40e   :  { %1229 = vmatmul.msk.f32.vlgmr.msrb.gmra.mxu2 %vm1992_vm12, %v1532_v8  ;;  %1241 = vmatmul.msk.f32.vlgmr.msrb.gmra.mxu0 %vm1993_vm0, %v1532_v8 }
 0x416   :  { %1244 = vmatmul.msk.f32.vlgmr.msra.gmra.mxu2 %vm1994_vm10, %v806_v21  ;;  %1246 = vmatmul.msk.f32.vlgmr.msra.gmra.mxu0 %vm829_vm8, %v1816_v29 }
 0x47b   :  { %v883_v46 = vpop.f32.mrf.mxu0 }
 0x481   :  { %v826_v44 = vpop.f32.mrf.mxu2 }
 0x482   :  { %v937_v15 = vpop.f32.mrf.mxu3  ;;  %v851_v8 = vadd.f32 %v850_v43, %v826_v44 }
 0x483   :  { %v957_v23 = vpop.f32.mrf.mxu0 }
 0x484   :  { %v857_v58 = vadd.f32 %v1258_v49, %v851_v8  ;;  %v958_v31 = vadd.f32 %v957_v23, %v937_v15 }
 0x486   :  { %v965_v21 = vadd.f32 %v1259_v32, %v958_v31 }
 0x489   :  { %v903_v47 = vpop.f32.mrf.mxu2 }
 0x48a   :  { %v904_v48 = vadd.f32 %v903_v47, %v883_v46  ;;  %v1021_v9 = vpop.f32.mrf.mxu3  ;;  %v1264_v47 = vld [vmem:[%s1971_s15] ss:$0 sm:$0xff] }
 0x48b   :  { %v1022_v53 = vadd.f32 %v1261_v16, %v1021_v9  ;;  %v1051_v10 = vpop.f32.mrf.mxu0 }
 0x48c   :  { %v911_v7 = vadd.f32 %v1260_v45, %v904_v48  ;;  %v1052_v29 = vadd.f32 %v1263_v52, %v1051_v10 }
 0x48e   :  { %v1074_v54 = vadd.f32 %v1022_v53, %v911_v7 }
 0x490   :  { %v1243_v55 = vmul.f32 -1.442695, %v1074_v54 }
 0x491   :  { %v991_v56 = vpop.f32.mrf.mxu2 }
 0x492   :  { %1313 = vpow2.f32 %v1243_v55  ;;  %v992_v59 = vadd.f32 %v1262_v50, %v991_v56 }
 0x493   :  { %v1171_v45 = vpop.f32.mrf.mxu0 }
 0x494   :  { %v1054_v61 = vadd.f32 %v992_v59, %v857_v58 }
 0x496   :  { %v1242_v62 = vmul.f32 -1.442695, %v1054_v61 }
 0x498   :  { %v1314_v63 = vpop.eup %1313  ;;  %1315 = vpow2.f32 %v1242_v62 }
 0x499   :  { %v1078_v0 = vadd.f32 1.0, %v1314_v63  ;;  %v1126_v15 = vpop.f32.mrf.mxu2 }
 0x49b   :  { %1317 = vrcp.f32 %v1078_v0  ;;  %v1090_v35 = vand.u32 2147483648, %v1078_v0  ;;  %vm1084_vm11 = vweird.f32 %v1078_v0  ;;  %v1088_v36 = vand.u32 2147483647, %v1078_v0 }
 0x49d   :  { %v1091_v38 = vor.u32 1.1754944e-38, %v1090_v35  ;;  %vm1089_vm7 = vcmp.eq.f32.partialorder %v1088_v36, 8.507059e+37 }
 0x49e   :  { %v1316_v3 = vpop.eup %1315 }
 0x49f   :  { %v1058_v4 = vadd.f32 1.0, %v1316_v3 }
 0x4a1   :  { %1319 = vrcp.f32 %v1058_v4  ;;  %v1318_v5 = vpop.eup %1317  ;;  %v1070_v22 = vand.u32 2147483648, %v1058_v4  ;;  %v1068_v20 = vand.u32 2147483647, %v1058_v4  ;;  %vm1064_vm13 = vweird.f32 %v1058_v4 }
 0x4a2   :  { %v1080_v51 = vmul.f32 %v1318_v5, %v1078_v0  ;;  %vm1085_vm9 = vweird.f32 %v1318_v5 }
 0x4a3   :  { %v1071_v33 = vor.u32 1.1754944e-38, %v1070_v22  ;;  %vm1069_vm15 = vcmp.eq.f32.partialorder %v1068_v20, 8.507059e+37  ;;  %vm1086_vm8 = vmor %vm1084_vm11, %vm1085_vm9 }
 0x4a4   :  { %v1081_v25 = vsub.f32 1.0, %v1080_v51 }
 0x4a6   :  { %v1082_v30 = vmul.f32 %v1318_v5, %v1081_v25 }
 0x4a7   :  { %v1320_v24 = vpop.eup %1319 }
 0x4a8   :  { %v1060_v14 = vmul.f32 %v1320_v24, %v1058_v4  ;;  %vm1065_vm6 = vweird.f32 %v1320_v24  ;;  %v1083_v60 = vadd.f32 %v1318_v5, %v1082_v30 }
 0x4a9   :  { %vm1066_vm14 = vmor %vm1064_vm13, %vm1065_vm6 }
 0x4aa   :  { %v1061_v26 = vsub.f32 1.0, %v1060_v14  ;;  %v1087_v39 = vsel %vm1086_vm8, %v1318_v5, %v1083_v60 }
 0x4ab   :  { %v1092_v17 = vsel %vm1089_vm7, %v1091_v38, %v1087_v39 }
 0x4ac   :  { %v1062_v27 = vmul.f32 %v1320_v24, %v1061_v26  ;;  %v1097_v19 = vsub.f32 1.0, %v1092_v17  ;;  %v1099_v43 = vmul.f32 %v1323_v42, %v1092_v17 }
 0x4ae   :  { %v1063_v18 = vadd.f32 %v1320_v24, %v1062_v27 }
 0x4b0   :  { %v1067_v28 = vsel %vm1066_vm14, %v1320_v24, %v1063_v18 }
 0x4b1   :  { %v1072_v34 = vsel %vm1069_vm15, %v1071_v33, %v1067_v28 }
 0x4b2   :  { %v1094_v57 = vmul.f32 %v1072_v34, %v1052_v29 }
 0x4b4   :  { %v1095_v37 = vadd.f32 %v1094_v57, %v965_v21 }
 0x4b6   :  { %1321 = vtanh.f32 %v1095_v37 }
 0x4bc   :  { %v1322_v40 = vpop.eup %1321 }
 0x4bd   :  { %v1098_v41 = vmul.f32 %v1322_v40, %v1097_v19 }
 0x4bf   :  { %v1100_v44 = vadd.f32 %v1099_v43, %v1098_v41 }
 0x4c1   :  { %1245 = vmatmul.msk.f32.vlgmr.msra.gmra.mxu3 %vm1995_vm1, %v1100_v44  ;;  %1181 = vst.msk [vmem:[%s1973_s17] sm:$0xff] %vm1996_vm2, %v1100_v44 }
 0x544   :  { %v1149_v16 = vpop.f32.mrf.mxu3 }
 0x545   :  { %v1150_v46 = vadd.f32 %v1149_v16, %v1126_v15 }
 0x547   :  { %v1174_v48 = vadd.f32 %v1171_v45, %v1150_v46 }
 0x549   :  { %v1179_v9 = vadd.f32 %v1264_v47, %v1174_v48 }
 0x54b   :  { %1180 = vst [vmem:[%s1972_s16] sm:$0xff] %v1179_v9 }
 0x54c   :  { %1190 = vsyncpa [#allocation3], 1 }
 0x54d   :  { %1191 = vsyncpa [#allocation5], 1 }

</bundles_post_ra>
